<compile_context>
chip_gen: v6e
topology: v6e:2x2x1
jax: 0.10.0
libtpu: 0.0.40
codegen_flags: <defaults>
</compile_context>

<pallas_src>
import jax
import jax.numpy as jnp
from jax.experimental import pallas as pl
from jax.experimental.pallas import tpu as pltpu


def _round_up(x, m):
    return ((x + m - 1) // m) * m


# ---------------------------------------------------------------------------
# Fused Pallas kernel (grid = (num_layers,), axis is "arbitrary": z carries)
#   z_l = PReLU( A_hat @ (z_{l-1} @ W_l) + b_l )     (bf16 MXU, f32 accumulate)
#   g_l = Pool @ z_l                                  (global_add_pool epilogue)
# ---------------------------------------------------------------------------
def gconv_fused_kernel(a_ref, x_ref, w_ref, b_ref, alpha_ref, pool_ref,
                       z_out_ref, g_out_ref, z_sc):
    layer = pl.program_id(0)

    @pl.when(layer == 0)
    def _():
        z_sc[...] = x_ref[...]

    # Matmuls on the MXU in bf16 with f32 accumulation.
    z_bf = z_sc[...].astype(jnp.bfloat16)
    zw = jnp.dot(z_bf, w_ref[0], preferred_element_type=jnp.float32)      # (NP, HP)
    h = jnp.dot(a_ref[...], zw.astype(jnp.bfloat16),
                preferred_element_type=jnp.float32)                        # (NP, HP)

    # f32 epilogue: bias + per-channel PReLU (shared alpha).
    h = h + b_ref[0]                                                       # (1, HP) bcast
    act = jnp.where(h > 0.0, h, alpha_ref[...] * h)

    z_sc[...] = act
    z_out_ref[...] = act
    # global_add_pool: small (GP, NP) x (NP, HP) matmul on VMEM-resident data.
    g_out_ref[0] = jnp.dot(pool_ref[...], act, preferred_element_type=jnp.float32)


# ---------------------------------------------------------------------------
# Plain-JAX glue (matches torch_geometric GCNConv defaults:
# add_self_loops=True, normalize=True, symmetric D^-1/2 (A+I) D^-1/2).
# Assumes edge_index has no pre-existing self loops (as PyG's gcn_norm
# add_remaining_self_loops would not double-count them).
# ---------------------------------------------------------------------------
def normalized_adjacency(edge_index, num_nodes):
    src, tgt = edge_index[0], edge_index[1]
    a = jnp.zeros((num_nodes, num_nodes), jnp.float32).at[tgt, src].add(1.0)
    a = a + jnp.eye(num_nodes, dtype=jnp.float32)  # self loops
    deg = a.sum(axis=1)
    dinv = jnp.where(deg > 0.0, 1.0 / jnp.sqrt(deg), 0.0)
    return dinv[:, None] * a * dinv[None, :]


def glorot(key, shape):
    fan_out, fan_in = shape
    limit = jnp.sqrt(6.0 / (fan_in + fan_out))
    return jax.random.uniform(key, shape, jnp.float32, -limit, limit)


def init_gconv_params(key, input_dim, hidden_dim, num_layers):
    """GCNConv: glorot weight (out, in), zero bias. PReLU(hidden_dim): 0.25."""
    params = []
    for i in range(num_layers):
        key, sub = jax.random.split(key)
        in_d = input_dim if i == 0 else hidden_dim
        w = glorot(sub, (hidden_dim, in_d))
        b = jnp.zeros((hidden_dim,), jnp.float32)
        params.append((w, b))
    alpha = jnp.full((hidden_dim,), 0.25, jnp.float32)  # shared across layers
    return params, alpha


def gconv_forward(x, edge_index, batch, params, alpha, num_graphs):
    n, input_dim = x.shape
    hidden = params[0][0].shape[0]
    num_layers = len(params)

    # Padded sizes: lane dims -> multiples of 128, sublane dims -> multiples of 8.
    NP = _round_up(max(n, 8), 128)                      # node dim (lane axis of A_hat)
    HP = _round_up(max(hidden, input_dim), 128)         # feature / hidden dim
    GP = _round_up(max(num_graphs, 1), 8)               # graph dim (sublane)

    # Normalized adjacency, zero-padded, cast to bf16 for the MXU.
    a_hat = normalized_adjacency(edge_index, n)
    a_p = jnp.zeros((NP, NP), jnp.float32).at[:n, :n].set(a_hat).astype(jnp.bfloat16)

    # Padded node features (f32; cast to bf16 inside the kernel per matmul).
    x_p = jnp.zeros((NP, HP), jnp.float32).at[:n, :input_dim].set(x)

    # Pre-transposed, stacked, zero-padded weights (L, in_pad, out_pad) in bf16.
    w_stack = jnp.zeros((num_layers, HP, HP), jnp.float32)
    b_stack = jnp.zeros((num_layers, 1, HP), jnp.float32)
    for i, (w, b) in enumerate(params):
        w_stack = w_stack.at[i, : w.shape[1], : w.shape[0]].set(w.T)
        b_stack = b_stack.at[i, 0, : b.shape[0]].set(b)
    w_stack = w_stack.astype(jnp.bfloat16)

    alpha_p = jnp.zeros((1, HP), jnp.float32).at[0, :hidden].set(alpha)

    # One-hot pooling matrix (G, N), zero-padded; padded nodes contribute 0.
    pool = (batch[None, :] == jnp.arange(num_graphs)[:, None]).astype(jnp.float32)
    pool_p = jnp.zeros((GP, NP), jnp.float32).at[:num_graphs, :n].set(pool)

    z_p, g_p = pl.pallas_call(
        gconv_fused_kernel,
        out_shape=(
            jax.ShapeDtypeStruct((NP, HP), jnp.float32),             # final z
            jax.ShapeDtypeStruct((num_layers, GP, HP), jnp.float32),  # pooled per layer
        ),
        grid_spec=pltpu.PrefetchScalarGridSpec(
            num_scalar_prefetch=0,
            grid=(num_layers,),
            in_specs=[
                pl.BlockSpec((NP, NP), lambda l: (0, 0)),        # A_hat (resident)
                pl.BlockSpec((NP, HP), lambda l: (0, 0)),        # x     (resident)
                pl.BlockSpec((1, HP, HP), lambda l: (l, 0, 0)),  # W_l   (per layer)
                pl.BlockSpec((1, 1, HP), lambda l: (l, 0, 0)),   # b_l   (per layer)
                pl.BlockSpec((1, HP), lambda l: (0, 0)),         # alpha (resident)
                pl.BlockSpec((GP, NP), lambda l: (0, 0)),        # pool  (resident)
            ],
            out_specs=[
                pl.BlockSpec((NP, HP), lambda l: (0, 0)),        # last-layer z
                pl.BlockSpec((1, GP, HP), lambda l: (l, 0, 0)),  # g per layer
            ],
            scratch_shapes=[pltpu.VMEM((NP, HP), jnp.float32)],  # running z
        ),
        compiler_params=pltpu.CompilerParams(
            dimension_semantics=("arbitrary",),     # z carries across layers
            vmem_limit_bytes=64 * 1024 * 1024,
        ),
    )(a_p, x_p, w_stack, b_stack, alpha_p, pool_p)

    z = z_p[:n, :hidden]
    g = jnp.concatenate(
        [g_p[i, :num_graphs, :hidden] for i in range(num_layers)], axis=1
    )
    return z, g


# ---------------------------------------------------------------------------
if __name__ == "__main__":
    key = jax.random.PRNGKey(0)

    num_nodes = 16
    input_dim = 8
    hidden_dim = 32
    num_layers = 2
    num_graphs = 2
    nodes_per_graph = num_nodes // num_graphs

    # Node features
    key, xkey, pkey = jax.random.split(key, 3)
    x = jax.random.normal(xkey, (num_nodes, input_dim), jnp.float32)

    # Simple undirected ring within each graph
    edges = []
    for gidx in range(num_graphs):
        base = gidx * nodes_per_graph
        for i in range(nodes_per_graph):
            j = (i + 1) % nodes_per_graph
            edges.append((base + i, base + j))
            edges.append((base + j, base + i))
    edge_index = jnp.asarray(edges, dtype=jnp.int32).T  # (2, E)

    # batch assignment vector (nodes sorted by graph)
    batch = jnp.repeat(jnp.arange(num_graphs, dtype=jnp.int32), nodes_per_graph)

    params, alpha = init_gconv_params(pkey, input_dim, hidden_dim, num_layers)

    z, g = gconv_forward(x, edge_index, batch, params, alpha, num_graphs)
    jax.block_until_ready((z, g))

    assert z.shape == (num_nodes, hidden_dim)
    assert g.shape == (num_graphs, num_layers * hidden_dim)
    assert bool(jnp.all(jnp.isfinite(z))) and bool(jnp.all(jnp.isfinite(g)))
    print("KERNEL_OK")
</pallas_src>

<mosaic_0001>
module attributes {stable_mosaic.version = 11 : i64} {
  func.func @gconv_fused_kernel(%arg0: i32, %arg1: memref<128x128xbf16, #tpu.memory_space<vmem>>, %arg2: memref<128x128xf32, #tpu.memory_space<vmem>>, %arg3: memref<1x128x128xbf16, #tpu.memory_space<vmem>>, %arg4: memref<1x1x128xf32, #tpu.memory_space<vmem>>, %arg5: memref<1x128xf32, #tpu.memory_space<vmem>>, %arg6: memref<8x128xf32, #tpu.memory_space<vmem>>, %arg7: memref<128x128xf32, #tpu.memory_space<vmem>>, %arg8: memref<1x8x128xf32, #tpu.memory_space<vmem>>, %arg9: memref<128x128xf32, #tpu.memory_space<vmem>>) attributes {dimension_semantics = [#tpu.dimension_semantics<arbitrary>], iteration_bounds = array<i64: 2>, scalar_prefetch = 0 : i64, scratch_operands = 1 : i64, tpu.core_type = #tpu.core_type<tc>, window_params = [{pipeline_mode = #tpu.pipeline_mode<synchronous>, transform_indices = @transform_0, window_bounds = array<i64: 128, 128>}, {pipeline_mode = #tpu.pipeline_mode<synchronous>, transform_indices = @transform_1, window_bounds = array<i64: 128, 128>}, {transform_indices = @transform_2, window_bounds = array<i64: 1, 128, 128>}, {transform_indices = @transform_3, window_bounds = array<i64: 1, 1, 128>}, {pipeline_mode = #tpu.pipeline_mode<synchronous>, transform_indices = @transform_4, window_bounds = array<i64: 1, 128>}, {pipeline_mode = #tpu.pipeline_mode<synchronous>, transform_indices = @transform_5, window_bounds = array<i64: 8, 128>}, {pipeline_mode = #tpu.pipeline_mode<synchronous>, transform_indices = @transform_6, window_bounds = array<i64: 128, 128>}, {transform_indices = @transform_7, window_bounds = array<i64: 1, 8, 128>}]} {
    %c0_i32 = arith.constant 0 : i32
    %0 = arith.cmpi eq, %arg0, %c0_i32 : i32
    %1 = arith.extui %0 : i1 to i32
    %c0_i32_0 = arith.constant 0 : i32
    %2 = arith.cmpi ne, %1, %c0_i32_0 : i32
    scf.if %2 {
      %c0_24 = arith.constant 0 : index
      %c0_25 = arith.constant 0 : index
      %28 = vector.load %arg2[%c0_24, %c0_25] : memref<128x128xf32, #tpu.memory_space<vmem>>, vector<128x128xf32>
      %c0_26 = arith.constant 0 : index
      %c0_27 = arith.constant 0 : index
      %29 = vector.load %arg9[%c0_26, %c0_27] : memref<128x128xf32, #tpu.memory_space<vmem>>, vector<128x128xf32>
      tpu.vector_store %arg9[%c0_26, %c0_27], %28 {strides = array<i32>} : memref<128x128xf32, #tpu.memory_space<vmem>>, vector<128x128xf32>,
    } else {
    }
    %c0 = arith.constant 0 : index
    %c0_1 = arith.constant 0 : index
    %3 = vector.load %arg9[%c0, %c0_1] : memref<128x128xf32, #tpu.memory_space<vmem>>, vector<128x128xf32>
    %4 = arith.truncf %3 : vector<128x128xf32> to vector<128x128xbf16>
    %c0_2 = arith.constant 0 : index
    %c0_3 = arith.constant 0 : index
    %c0_4 = arith.constant 0 : index
    %5 = vector.load %arg3[%c0_2, %c0_3, %c0_4] : memref<1x128x128xbf16, #tpu.memory_space<vmem>>, vector<1x128x128xbf16>
    %6 = vector.shape_cast %5 : vector<1x128x128xbf16> to vector<128x128xbf16>
    %cst = arith.constant dense<0.000000e+00> : vector<128x128xf32>
    %7 = tpu.matmul %4, %6, %cst {dimension_numbers = #tpu.dot_dimension_numbers<[1], [0], [0], [1], [0, 0, 1, 1], [], []>} : vector<128x128xbf16>, vector<128x128xbf16>, vector<128x128xf32> -> vector<128x128xf32>
    %c0_5 = arith.constant 0 : index
    %c0_6 = arith.constant 0 : index
    %8 = vector.load %arg1[%c0_5, %c0_6] : memref<128x128xbf16, #tpu.memory_space<vmem>>, vector<128x128xbf16>
    %9 = arith.truncf %7 : vector<128x128xf32> to vector<128x128xbf16>
    %cst_7 = arith.constant dense<0.000000e+00> : vector<128x128xf32>
    %10 = tpu.matmul %8, %9, %cst_7 {dimension_numbers = #tpu.dot_dimension_numbers<[1], [0], [0], [1], [0, 0, 1, 1], [], []>} : vector<128x128xbf16>, vector<128x128xbf16>, vector<128x128xf32> -> vector<128x128xf32>
    %c0_8 = arith.constant 0 : index
    %c0_9 = arith.constant 0 : index
    %c0_10 = arith.constant 0 : index
    %11 = vector.load %arg4[%c0_8, %c0_9, %c0_10] : memref<1x1x128xf32, #tpu.memory_space<vmem>>, vector<1x1x128xf32>
    %12 = vector.shape_cast %11 : vector<1x1x128xf32> to vector<1x128xf32>
    %13 = vector.broadcast %12 : vector<1x128xf32> to vector<128x128xf32>
    %14 = arith.addf %10, %13 : vector<128x128xf32>
    %cst_11 = arith.constant 0.000000e+00 : f32
    %15 = vector.broadcast %cst_11 : f32 to vector<128x128xf32>
    %16 = arith.cmpf ogt, %14, %15 : vector<128x128xf32>
    %c0_12 = arith.constant 0 : index
    %c0_13 = arith.constant 0 : index
    %17 = vector.load %arg5[%c0_12, %c0_13] : memref<1x128xf32, #tpu.memory_space<vmem>>, vector<1x128xf32>
    %18 = vector.broadcast %17 : vector<1x128xf32> to vector<128x128xf32>
    %19 = arith.mulf %18, %14 : vector<128x128xf32>
    %20 = arith.select %16, %14, %19 : vector<128x128xi1>, vector<128x128xf32>
    %c0_14 = arith.constant 0 : index
    %c0_15 = arith.constant 0 : index
    %21 = vector.load %arg9[%c0_14, %c0_15] : memref<128x128xf32, #tpu.memory_space<vmem>>, vector<128x128xf32>
    tpu.vector_store %arg9[%c0_14, %c0_15], %20 {strides = array<i32>} : memref<128x128xf32, #tpu.memory_space<vmem>>, vector<128x128xf32>,
    %c0_16 = arith.constant 0 : index
    %c0_17 = arith.constant 0 : index
    %22 = vector.load %arg7[%c0_16, %c0_17] : memref<128x128xf32, #tpu.memory_space<vmem>>, vector<128x128xf32>
    tpu.vector_store %arg7[%c0_16, %c0_17], %20 {strides = array<i32>} : memref<128x128xf32, #tpu.memory_space<vmem>>, vector<128x128xf32>,
    %c0_18 = arith.constant 0 : index
    %c0_19 = arith.constant 0 : index
    %23 = vector.load %arg6[%c0_18, %c0_19] : memref<8x128xf32, #tpu.memory_space<vmem>>, vector<8x128xf32>
    %cst_20 = arith.constant dense<0.000000e+00> : vector<8x128xf32>
    %24 = tpu.matmul %23, %20, %cst_20 {dimension_numbers = #tpu.dot_dimension_numbers<[1], [0], [0], [1], [0, 0, 1, 1], [], []>} : vector<8x128xf32>, vector<128x128xf32>, vector<8x128xf32> -> vector<8x128xf32>
    %c0_21 = arith.constant 0 : index
    %c0_22 = arith.constant 0 : index
    %c0_23 = arith.constant 0 : index
    %25 = vector.load %arg8[%c0_21, %c0_22, %c0_23] : memref<1x8x128xf32, #tpu.memory_space<vmem>>, vector<1x8x128xf32>
    %26 = vector.shape_cast %25 : vector<1x8x128xf32> to vector<8x128xf32>
    %27 = vector.shape_cast %24 : vector<8x128xf32> to vector<1x8x128xf32>
    tpu.vector_store %arg8[%c0_21, %c0_22, %c0_23], %27 {strides = array<i32>} : memref<1x8x128xf32, #tpu.memory_space<vmem>>, vector<1x8x128xf32>,
    return
  }
  func.func @transform_0(%arg0: i32) -> (i32, i32) {
    %c0_i32 = arith.constant 0 : i32
    %c0_i32_0 = arith.constant 0 : i32
    %c0_i32_1 = arith.constant 0 : i32
    return %c0_i32, %c0_i32_0 : i32, i32
  }
  func.func @transform_1(%arg0: i32) -> (i32, i32) {
    %c0_i32 = arith.constant 0 : i32
    %c0_i32_0 = arith.constant 0 : i32
    %c0_i32_1 = arith.constant 0 : i32
    return %c0_i32, %c0_i32_0 : i32, i32
  }
  func.func @transform_2(%arg0: i32) -> (i32, i32, i32) {
    %c0_i32 = arith.constant 0 : i32
    %c0_i32_0 = arith.constant 0 : i32
    %c0_i32_1 = arith.constant 0 : i32
    return %arg0, %c0_i32, %c0_i32_0 : i32, i32, i32
  }
  func.func @transform_3(%arg0: i32) -> (i32, i32, i32) {
    %c0_i32 = arith.constant 0 : i32
    %c0_i32_0 = arith.constant 0 : i32
    %c0_i32_1 = arith.constant 0 : i32
    return %arg0, %c0_i32, %c0_i32_0 : i32, i32, i32
  }
  func.func @transform_4(%arg0: i32) -> (i32, i32) {
    %c0_i32 = arith.constant 0 : i32
    %c0_i32_0 = arith.constant 0 : i32
    %c0_i32_1 = arith.constant 0 : i32
    return %c0_i32, %c0_i32_0 : i32, i32
  }
  func.func @transform_5(%arg0: i32) -> (i32, i32) {
    %c0_i32 = arith.constant 0 : i32
    %c0_i32_0 = arith.constant 0 : i32
    %c0_i32_1 = arith.constant 0 : i32
    return %c0_i32, %c0_i32_0 : i32, i32
  }
  func.func @transform_6(%arg0: i32) -> (i32, i32) {
    %c0_i32 = arith.constant 0 : i32
    %c0_i32_0 = arith.constant 0 : i32
    %c0_i32_1 = arith.constant 0 : i32
    return %c0_i32, %c0_i32_0 : i32, i32
  }
  func.func @transform_7(%arg0: i32) -> (i32, i32, i32) {
    %c0_i32 = arith.constant 0 : i32
    %c0_i32_0 = arith.constant 0 : i32
    %c0_i32_1 = arith.constant 0 : i32
    return %arg0, %c0_i32, %c0_i32_0 : i32, i32, i32
  }
}

</mosaic_0001>

<bundles_post_ra>
// kernel: tpu_custom_call.1
= control target key start
LH: loop header
LB: loop body
LE: loop exit
PB: predicated region body
PF: predicated region fallthrough
CT: control target
= control target key end

     0   :  { %s1977_s0 = inlined_call_operand.hbm [shape: bf16[128,128], index: 0, kind: input, shape index: {}]   ;;  %s1978_s1 = inlined_call_operand.hbm [shape: f32[128,128], index: 1, kind: input, shape index: {}]   ;;  %s1979_s2 = inlined_call_operand.hbm [shape: bf16[2,128,128], index: 2, kind: input, shape index: {}]   ;;  %s1980_s3 = inlined_call_operand.hbm [shape: f32[2,1,128], index: 3, kind: input, shape index: {}]   ;;  %s1981_s4 = inlined_call_operand.vmem [shape: f32[1,128], index: 4, kind: input, shape index: {}]   ;;  %s1982_s5 = inlined_call_operand.vmem [shape: f32[8,128], index: 5, kind: input, shape index: {}]   ;;  %s1983_s6 = inlined_call_operand.hbm [shape: f32[128,128], index: 6, kind: output, shape index: {0}]   ;;  %s1984_s7 = inlined_call_operand.hbm [shape: f32[2,8,128], index: 7, kind: output, shape index: {1}]  }
   0x1   :  { %1996 = sst [smem:[#allocation21_spill]] %s1977_s0 }
   0x2   :  { %1997 = sst [smem:[#allocation22_spill]] %s1979_s2 }
   0x3   :  { %13 = vsyncpa [#allocation4], 0 }
   0x4   :  { %14 = vsyncpa [#allocation7], 0 }
   0x5   :  { %15 = vsyncpa [#allocation5], 0 }
   0x6   :  { %16 = vsyncpa [#allocation12], 0 }
   0x7   :  { %18 = vsyncpa [#allocation12 + $0x1], 0  ;;  %s1612_s24 = smov 0   ;;  %s1614_s25 = smov 0  }
   0x8   :  { %s1616_s26 = smov 0   ;;  %s1618_s27 = smov 0  }
   0x9 LB: > { %s1633_s28 = sadd.s32 4294967295, %s1556_s27   ;;  %s1057_s29 = sadd.s32 4294967294, %s1556_s27   ;;  %s1556_s27 = sphi %s1618_s27, %s2028_s27   ;;  %s1552_s26 = sphi %s1616_s26, %s2032_s26   ;;  %s1548_s25 = sphi %s1614_s25, %s2031_s25   ;;  %s1544_s24 = sphi %s1612_s24, %s2030_s24  }
   0xa   : > { %s1637_s30 = sadd.s32 1, %s1556_s27   ;;  %s73_s8 = sadd.s32 1, %s1552_s26 }
   0xb   : > { %1998 = sst [smem:[#allocation18_spill]] %s1637_s30  ;;  %s70_s9 = ssub.s32 %s1556_s27, %s1637_s30 }
   0xc   : > { %p80_p0 = scmp.ne.s32.totalorder %s1552_s26, %s1548_s25  ;;  %p71_p1 = scmp.eq.s32.totalorder %s70_s9, 0 }
   0xd   : > { %p81_p2 = scmp.eq.s32.totalorder %s1556_s27, 0  ;;  %p86_p3 = scmp.ne.s32.totalorder %s1548_s25, %s1544_s24 }
   0xe   : > { %p1993_p4 = scmp.eq.s32.totalorder %s1633_s28, 0  ;;  %p1985_p7 = scmp.eq.s32.totalorder %s1633_s28, 1 }
   0xf   : > { %s1649_s10 = scalar_select %p71_p1, %s1552_s26, %s73_s8  }
  0x10   : > { %p1651_p5 = por %p81_p2, %p80_p0  ;;  %p1657_p6 = por %p1993_p4, %p86_p3 }
  0x11   : > { %1999 = sst [smem:[#allocation19_spill]] %s1649_s10  ;;  %p205_p8 = scmp.eq.s32.totalorder %s1057_s29, 1 }
  0x12   : > { %s2001_s12 = scalar_select %p1657_p6, 1, 0 }
  0x13   : > { %p1058_p9 = scmp.ge.s32.totalorder %s1556_s27, 1  ;;  %p212_p10 = scmp.lt.s32.totalorder %s1556_s27, 3 }
  0x14   : > { %p1666_p11 = por %p1985_p7, %p80_p0  ;;  %p1670_p12 = por %p205_p8, %p86_p3 }
  0x15   : > { %p1674_p13 = pnand %p1058_p9, %p212_p10  ;;  %s1558_s16 = smov [#allocation3]  }
  0x16   : > { %s2002_s13 = scalar_select %p1666_p11, 1, 0 }
  0x17   : > { %s2003_s14 = scalar_select %p1670_p12, 1, 0 }
  0x18   : > { %s2005_s15 = scalar_select %p1674_p13, 1, 0 }
  0x19   : > { %2004 = sst [smem:[#allocation20_spill]] %s2003_s14  ;;  %p1263_p2 = pneg %p1674_p13 }
  0x1a   : > { %s224_s17 = sshll.u32 %s1558_s16, 4  ;;  %p1283_p8 = scmp.lt.s32.totalorder %s1556_s27, 2  ;;  %s225_s17 = int_to_ptr.vmem [resolvable:$true] %s224_s17 }
  0x1b   : > { %p1683_p0 = pnand %p1263_p2, %p1993_p4  ;;  %s257_s19 = sand.u32 1, %s1556_s27  }
  0x1c   : > { %s1359_s20 = scalar_lea.vmem %s225_s17, 1024  ;;  %p1367_p12 = scmp.lt.s32.totalorder %s225_s17, %s225_s17 }
  0x1d   : > { %p1994_p9 = pneg %p1683_p0  ;;  %p1360_p10 = scmp.ne.s32.totalorder %s225_s17, %s1359_s20 }
  0x1e   : > { %p1368_p11 = scmp.lt.s32.totalorder %s1359_s20, %s1359_s20 }
  0x1f   : > { %p1362_p7 = pnand %p1360_p10, %p1994_p9 }
  0x20   : > { %p1369_p6 = por %p1368_p11, %p1367_p12 }
  0x21   : > { %p1363_p1 = pneg %p1362_p7 }
  0x23   : > { %p1370_p2 = pnand %p1369_p6, %p1363_p1 }
  0x25   : > { %1373 = shalt.err (!%p1370_p2)
}
  0x26   : > { %s1992_s21 = smov 64   ;;  %s1560_s22 = smov 4  }
  0x27   : > { %s2007_s0 = sld [smem:[#allocation21_spill]]  ;;  %p1707_p6 = pnand %p1283_p8, %p1651_p5 }
  0x28   : > { %s1991_s9 = sand.u32 1, %s1552_s26   ;;  %s1096_s20 = sshll.u32 %s1556_s27, 10 }
  0x29   : > { %s1062_s16 = sshll.u32 %s1991_s9, 6  ;;  %s2009_s2 = sld [smem:[#allocation22_spill]] }
  0x2a   : > { %s261_s11 = scalar_lea.vmem [#allocation8], %s1062_s16  ;;  %s1722_s23 = scalar_lea.sflag [#allocation4], %s257_s19 }
  0x2b   : > { %p1376_p7 = pneg %p1707_p6 }
  0x2d   : > { %1266 = dma.hbm_to_vmem [thread:$0]  (!%p1683_p0), %s2007_s0, 1024, %s225_s17, [#allocation4], %s1992_s21, %s1992_s21, %s1560_s22  }
  0x2e   : > { %s268_s17 = sshll.u32 %s261_s11, 4  ;;  %s1720_s17 = int_to_ptr.vmem [resolvable:$true] %s268_s17 }
  0x2f   : > { %s1718_s14 = scalar_lea.hbm %s2009_s2, %s1096_s20  ;;  %s1379_s20 = scalar_lea.hbm %s2009_s2, 2048 }
  0x30   : > { %s1374_s29 = scalar_lea.hbm %s1718_s14, 1024  ;;  %p1380_p1 = scmp.lt.s32.totalorder %s1718_s14, %s2009_s2 }
  0x31   : > { %p1375_p5 = scmp.ne.s32.totalorder %s1718_s14, %s1374_s29  ;;  %p1381_p8 = scmp.lt.s32.totalorder %s1379_s20, %s1374_s29 }
  0x33   : > { %p1377_p11 = pnand %p1376_p7, %p1375_p5  ;;  %p1382_p10 = por %p1381_p8, %p1380_p1 }
  0x35   : > { %p1378_p12 = pneg %p1377_p11 }
  0x37   : > { %p1383_p2 = pnand %p1382_p10, %p1378_p12 }
  0x39   : > { %1386 = shalt.err (!%p1383_p2)
}
  0x3a   : > { %s1387_s19 = scalar_lea.vmem %s1720_s17, 1024  ;;  %s1561_s16 = smov [#allocation8]  }
  0x3b   : > { %p1388_p3 = scmp.ne.s32.totalorder %s1720_s17, %s1387_s19  ;;  %s1392_s11 = sshll.u32 %s1561_s16, 4  ;;  %s1393_s11 = int_to_ptr.vmem [resolvable:$false] %s1392_s11 }
  0x3c   : > { %s1394_s30 = scalar_lea.vmem %s1393_s11, 2048  ;;  %p1395_p4 = scmp.lt.s32.totalorder %s1720_s17, %s1393_s11 }
  0x3d   : > { %p1390_p5 = pnand %p1388_p3, %p1376_p7  ;;  %p1396_p9 = scmp.lt.s32.totalorder %s1394_s30, %s1387_s19 }
  0x3f   : > { %p1391_p11 = pneg %p1390_p5  ;;  %p1397_p13 = por %p1396_p9, %p1395_p4 }
  0x41   : > { %p1398_p1 = pnand %p1397_p13, %p1391_p11 }
  0x43   : > { %1401 = shalt.err (!%p1398_p1)
}
  0x44   : > { %s2010_s21 = smov 64   ;;  %s1562_s9 = smov [#allocation6]  }
  0x45   : > { %1273 = dma.hbm_to_vmem [thread:$0]  (!%p1707_p6), %s1718_s14, 1024, %s1720_s17, %s1722_s23, %s2010_s21, %s2010_s21, %s1560_s22  }
  0x46   : > { %s237_s29 = sshll.u32 %s1562_s9, 4  ;;  %p2011_p12 = pneg %p1683_p0  ;;  %s238_s29 = int_to_ptr.vmem [resolvable:$true] %s237_s29 }
  0x47   : > { %s1413_s10 = scalar_lea.vmem %s238_s29, 2048  ;;  %p1421_p9 = scmp.lt.s32.totalorder %s238_s29, %s238_s29 }
  0x48   : > { %p1414_p3 = scmp.ne.s32.totalorder %s238_s29, %s1413_s10  ;;  %p1422_p8 = scmp.lt.s32.totalorder %s1413_s10, %s1413_s10 }
  0x4a   : > { %p1416_p4 = pnand %p1414_p3, %p2011_p12  ;;  %p1423_p10 = por %p1422_p8, %p1421_p9 }
  0x4c   : > { %p1417_p13 = pneg %p1416_p4 }
  0x4e   : > { %p1424_p2 = pnand %p1423_p10, %p1417_p13 }
  0x50   : > { %1427 = shalt.err (!%p1424_p2)
}
  0x51   : > { %s1563_s20 = smov 128   ;;  %s1564_s14 = smov 8  }
  0x52   : > { %1269 = dma.hbm_to_vmem [thread:$0]  (!%p1683_p0), %s1978_s1, 2048, %s238_s29, [#allocation7], %s1563_s20, %s1563_s20, %s1564_s14  }
  0x53   : > { %s1065_s19 = sshll.u32 %s1556_s27, 4  ;;  %s2012_s21 = sand.u32 1, %s1552_s26  }
  0x54   : > { %s286_s30 = scalar_lea.hbm %s1980_s3, %s1065_s19  ;;  %s281_s9 = scalar_lea.vmem [#allocation9], %s2012_s21 }
  0x55   : > { %s288_s10 = sshll.u32 %s281_s9, 4  ;;  %s1428_s0 = scalar_lea.hbm %s286_s30, 16  ;;  %s289_s10 = int_to_ptr.vmem [resolvable:$true] %s288_s10 }
  0x56   : > { %p1429_p5 = scmp.ne.s32.totalorder %s286_s30, %s1428_s0  ;;  %s1433_s22 = scalar_lea.hbm %s1980_s3, 32 }
  0x57   : > { %p1434_p0 = scmp.lt.s32.totalorder %s286_s30, %s1980_s3  ;;  %p1435_p3 = scmp.lt.s32.totalorder %s1433_s22, %s1428_s0 }
  0x58   : > { %p1431_p11 = pnand %p1429_p5, %p1376_p7 }
  0x59   : > { %p1436_p12 = por %p1435_p3, %p1434_p0 }
  0x5a   : > { %p1432_p1 = pneg %p1431_p11 }
  0x5c   : > { %p1437_p4 = pnand %p1436_p12, %p1432_p1 }
  0x5e   : > { %1440 = shalt.err (!%p1437_p4)
}
  0x5f   : > { %s1441_s14 = scalar_lea.vmem %s289_s10, 16  ;;  %s1565_s17 = smov [#allocation9]  }
  0x60   : > { %p1442_p13 = scmp.ne.s32.totalorder %s289_s10, %s1441_s14  ;;  %s1446_s19 = sshll.u32 %s1565_s17, 4  ;;  %s1447_s19 = int_to_ptr.vmem [resolvable:$false] %s1446_s19 }
  0x61   : > { %s1448_s2 = scalar_lea.vmem %s1447_s19, 32  ;;  %p1449_p10 = scmp.lt.s32.totalorder %s289_s10, %s1447_s19 }
  0x62   : > { %p1444_p9 = pnand %p1442_p13, %p1376_p7  ;;  %p1450_p2 = scmp.lt.s32.totalorder %s1448_s2, %s1441_s14 }
  0x64   : > { %p1445_p8 = pneg %p1444_p9  ;;  %p1451_p5 = por %p1450_p2, %p1449_p10 }
  0x66   : > { %p1452_p11 = pnand %p1451_p5, %p1445_p8 }
  0x68   : > { %1455 = shalt.err (!%p1452_p11)
}
  0x69   : > { %1276 = dma.hbm_to_vmem [thread:$0]  (!%p1707_p6), %s286_s30, 16, %s289_s10, %s1722_s23  }
  0x6a   : > { %p2013_p1 = scmp.ne.s32.totalorder %s2005_s15, 0 }
  0x6b   : > { %p2014_p0 = scmp.eq.s32.totalorder (!%p2013_p1), %s1633_s28, 0 }
  0x6c   : > { %297 = sbr.rel (%p2013_p1) target bundleno = 896 (0x380), region = 44 }
  0x71   : > { %1523 = dma.done.wait (%p2014_p0), [#allocation4], 1024   ;;  %p2015_p7 = pmov %p2014_p0 }
  0x72   : > { %p2016_p3 = pmov %p2014_p0 }
  0x73   : > { %1525 = vsyncadd (%p2015_p7), [#allocation4], 4294966272 }
  0x74   : > { %1527 = dma.done.wait (%p2016_p3), [#allocation7], 2048   ;;  %p2017_p12 = pmov %p2014_p0 }
  0x75   : > { %s307_s0 = sand.u32 1, %s1633_s28   ;;  %s1793_s8 = sand.u32 1, %s1548_s25  }
  0x76   : > { %1529 = vsyncadd (%p2017_p12), [#allocation7], 4294965248  ;;  %s1069_s15 = sshll.u32 %s1793_s8, 6  ;;  %s308_s23 = scalar_lea.sflag [#allocation4], %s307_s0 }
  0x77   : > { %s1796_s16 = scalar_lea.vmem [#allocation8], %s1069_s15  ;;  %p2018_p6 = scmp.ne.s32.totalorder %s2001_s12, 0 }
  0x79   : > { %1531 = dma.done.wait (%p2018_p6), %s308_s23, 1040  }
  0x7a   : > { %1533 = vsyncadd (%p2018_p6), %s308_s23, 4294966256  ;;  %s1070_s11 = sshll.u32 %s1793_s8, 3  ;;  %s319_s30 = scalar_lea.vmem [#allocation9], %s1793_s8 }
  0x7b   : > { %s1804_s21 = scalar_lea.vmem [#allocation11], %s1070_s11  ;;  %p2019_p4 = scmp.ne.s32.totalorder %s1633_s28, 0 }
  0x7d   : > { %358 = sbr.rel (%p2019_p4) target bundleno = 139 (0x8b), region = 64 }
  0x82   : > { %v359_v0 = vld [vmem:[#allocation6] sm:$0xff]  ;;  %v360_v1 = vld [vmem:[#allocation6 + $0x8] sm:$0xff]  ;;  %v361_v2 = vld [vmem:[#allocation6 + $0x10] sm:$0xff] }
  0x83   : > { %375 = vst [vmem:[#allocation2 + $0x30] sm:$0xff] %v359_v0  ;;  %376 = vst [vmem:[#allocation2] sm:$0xff] %v360_v1  ;;  %v362_v3 = vld [vmem:[#allocation6 + $0x18] sm:$0xff]  ;;  %v363_v4 = vld [vmem:[#allocation6 + $0x20] sm:$0xff] }
  0x84   : > { %377 = vst [vmem:[#allocation2 + $0x58] sm:$0xff] %v361_v2  ;;  %v364_v5 = vld [vmem:[#allocation6 + $0x28] sm:$0xff]  ;;  %378 = vst [vmem:[#allocation2 + $0x18] sm:$0xff] %v362_v3  ;;  %v365_v6 = vld [vmem:[#allocation6 + $0x30] sm:$0xff] }
  0x85   : > { %379 = vst [vmem:[#allocation2 + $0x50] sm:$0xff] %v363_v4  ;;  %380 = vst [vmem:[#allocation2 + $0x68] sm:$0xff] %v364_v5  ;;  %v366_v7 = vld [vmem:[#allocation6 + $0x38] sm:$0xff]  ;;  %v367_v8 = vld [vmem:[#allocation6 + $0x40] sm:$0xff] }
  0x86   : > { %381 = vst [vmem:[#allocation2 + $0x8] sm:$0xff] %v365_v6  ;;  %382 = vst [vmem:[#allocation2 + $0x48] sm:$0xff] %v366_v7  ;;  %v368_v9 = vld [vmem:[#allocation6 + $0x48] sm:$0xff]  ;;  %v369_v10 = vld [vmem:[#allocation6 + $0x50] sm:$0xff] }
  0x87   : > { %383 = vst [vmem:[#allocation2 + $0x40] sm:$0xff] %v367_v8  ;;  %v370_v11 = vld [vmem:[#allocation6 + $0x58] sm:$0xff]  ;;  %384 = vst [vmem:[#allocation2 + $0x20] sm:$0xff] %v368_v9  ;;  %v371_v12 = vld [vmem:[#allocation6 + $0x60] sm:$0xff] }
  0x88   : > { %385 = vst [vmem:[#allocation2 + $0x10] sm:$0xff] %v369_v10  ;;  %386 = vst [vmem:[#allocation2 + $0x38] sm:$0xff] %v370_v11  ;;  %v372_v13 = vld [vmem:[#allocation6 + $0x68] sm:$0xff]  ;;  %v373_v14 = vld [vmem:[#allocation6 + $0x70] sm:$0xff] }
  0x89   : > { %387 = vst [vmem:[#allocation2 + $0x60] sm:$0xff] %v371_v12  ;;  %388 = vst [vmem:[#allocation2 + $0x70] sm:$0xff] %v372_v13  ;;  %v374_v15 = vld [vmem:[#allocation6 + $0x78] sm:$0xff] }
  0x8a   : > { %389 = vst [vmem:[#allocation2 + $0x78] sm:$0xff] %v373_v14  ;;  %390 = vst [vmem:[#allocation2 + $0x28] sm:$0xff] %v374_v15 }
  0x8b PF: > { %v1332_v16 = vld [vmem:[%s1796_s16 + $0x38] sm:$0xff]   ;;  %v1333_v17 = vld [vmem:[%s1796_s16 + $0x30] sm:$0xff]   ;;  %v1334_v18 = vld [vmem:[%s1796_s16 + $0x28] sm:$0xff]   ;;  %vm1567_vm0 = vmmov 0   ;;  %s1568_s22 = smov [#allocation10]   ;;  %p2020_p9 = scmp.eq.s32.totalorder %s1633_s28, 1 }
  0x8c   : > { %1146 = vmatprep.subr.bf16.mxu0 %v1332_v16  ;;  %v1335_v19 = vld [vmem:[%s1796_s16 + $0x20] sm:$0xff]   ;;  %v391_v20 = vld [vmem:[#allocation2 + $0x30] sm:$0xff]  ;;  %v1336_v23 = vld [vmem:[%s1796_s16 + $0x18] sm:$0xff]   ;;  %s922_s29 = sshll.u32 %s1568_s22, 4  ;;  %s923_s29 = int_to_ptr.vmem [resolvable:$true] %s922_s29 }
  0x8d   : > { %1147 = vmatpush3.bf16.msra.mxu0 %v1332_v16  ;;  %v392_v21 = vld [vmem:[#allocation2] sm:$0xff]  ;;  %v1337_v24 = vld [vmem:[%s1796_s16 + $0x10] sm:$0xff]   ;;  %v1338_v25 = vld [vmem:[%s1796_s16 + $0x8] sm:$0xff]   ;;  %v1566_v16 = vmov 0.0   ;;  %s1456_s20 = scalar_lea.vmem %s923_s29, 2048  ;;  %p1463_p2 = scmp.lt.s32.totalorder %s923_s29, %s923_s29 }
  0x8e   : > { %1148 = vmatprep.subr.bf16.mxu0 %v1333_v17  ;;  %v407_v22 = vpack.c.bf16 %v392_v21, %v391_v20  ;;  %v1339_v26 = vld [vmem:[%s1796_s16] sm:$0xff]   ;;  %v393_v27 = vld [vmem:[#allocation2 + $0x58] sm:$0xff]  ;;  %v395_v29 = vld [vmem:[#allocation2 + $0x50] sm:$0xff]  ;;  %p1457_p13 = scmp.ne.s32.totalorder %s923_s29, %s1456_s20  ;;  %p1464_p5 = scmp.lt.s32.totalorder %s1456_s20, %s1456_s20 }
  0x8f   : > { %v394_v28 = vld [vmem:[#allocation2 + $0x18] sm:$0xff]  ;;  %v396_v30 = vld [vmem:[#allocation2 + $0x68] sm:$0xff]  ;;  %v399_v35 = vld [vmem:[#allocation2 + $0x40] sm:$0xff] }
  0x90   : > { %1162 = vmatprep.mubr.bf16.mxu0 %v407_v22  ;;  %v408_v31 = vpack.c.bf16 %v394_v28, %v393_v27  ;;  %v409_v32 = vpack.c.bf16 %v396_v30, %v395_v29  ;;  %v397_v33 = vld [vmem:[#allocation2 + $0x8] sm:$0xff]  ;;  %v400_v36 = vld [vmem:[#allocation2 + $0x20] sm:$0xff]  ;;  %v401_v39 = vld [vmem:[#allocation2 + $0x10] sm:$0xff]  ;;  %p1458_p8 = pnand %p1457_p13, %p2020_p9  ;;  %p1465_p11 = por %p1464_p5, %p1463_p2 }
  0x91   : > { %1149 = vmatpush3.bf16.msra.mxu0 %v1333_v17  ;;  %v398_v34 = vld [vmem:[#allocation2 + $0x48] sm:$0xff]  ;;  %v411_v38 = vpack.c.bf16 %v400_v36, %v399_v35  ;;  %v402_v40 = vld [vmem:[#allocation2 + $0x38] sm:$0xff]  ;;  %v403_v41 = vld [vmem:[#allocation2 + $0x60] sm:$0xff] }
  0x92   : > { %1150 = vmatprep.subr.bf16.mxu0 %v1334_v18  ;;  %v410_v37 = vpack.c.bf16 %v398_v34, %v397_v33  ;;  %v404_v42 = vld [vmem:[#allocation2 + $0x70] sm:$0xff]  ;;  %v412_v43 = vpack.c.bf16 %v402_v40, %v401_v39  ;;  %v405_v45 = vld [vmem:[#allocation2 + $0x78] sm:$0xff]  ;;  %v406_v46 = vld [vmem:[#allocation2 + $0x28] sm:$0xff]  ;;  %p1459_p10 = pneg %p1458_p8 }
  0x93   : > { %v413_v44 = vpack.c.bf16 %v404_v42, %v403_v41  ;;  %v414_v47 = vpack.c.bf16 %v406_v46, %v405_v45  ;;  %v1340_v48 = vld [vmem:[#allocation3] sm:$0xff]   ;;  %v1341_v9 = vld [vmem:[#allocation3 + $0x8] sm:$0xff]   ;;  %v1342_v10 = vld [vmem:[#allocation3 + $0x10] sm:$0xff]  }
  0x94   : > { %1194 = vmatprep.mubr.bf16.mxu1 %v1340_v48  ;;  %v1343_v11 = vld [vmem:[#allocation3 + $0x18] sm:$0xff]   ;;  %v1344_v12 = vld [vmem:[#allocation3 + $0x20] sm:$0xff]   ;;  %v1345_v13 = vld [vmem:[#allocation3 + $0x28] sm:$0xff]   ;;  %p1466_p1 = pnand %p1465_p11, %p1459_p10 }
  0x95   : > { %1151 = vmatpush3.bf16.msra.mxu0 %v1334_v18  ;;  %v1346_v14 = vld [vmem:[#allocation3 + $0x30] sm:$0xff]   ;;  %v1347_v15 = vld [vmem:[#allocation3 + $0x38] sm:$0xff]   ;;  %v1820_v17 = vld [vmem:[%s319_s30] ss:$0 sm:$0xff] }
  0x96   : > { %1152 = vmatprep.subr.bf16.mxu0 %v1335_v19 }
  0x99   : > { %1153 = vmatpush3.bf16.msra.mxu0 %v1335_v19  ;;  %v1825_v19 = vld [vmem:[%s1981_s4] ss:$0 sm:$0xff] }
  0x9a   : > { %1154 = vmatprep.subr.bf16.mxu0 %v1336_v23 }
  0x9d   : > { %1155 = vmatpush3.bf16.msra.mxu0 %v1336_v23 }
  0x9e   : > { %1156 = vmatprep.subr.bf16.mxu0 %v1337_v24 }
  0xa1   : > { %1157 = vmatpush3.bf16.msra.mxu0 %v1337_v24 }
  0xa2   : > { %1158 = vmatprep.subr.bf16.mxu0 %v1338_v25 }
  0xa5   : > { %1159 = vmatpush3.bf16.msra.mxu0 %v1338_v25 }
  0xa6   : > { %1160 = vmatprep.subr.bf16.mxu0 %v1339_v26 }
  0xa9   : > { %1161 = vmatpush3.bf16.msra.mxu0 %v1339_v26 }
  0xaa   : > { %1210 = vmatprep.subr.mxu0 %v1566_v16 }
  0xac   : > { %1163 = vmatmul.mubr.bf16.vlgmr.msra.gmra.mxu0 %v408_v31 }
  0xad   : > { %1166 = vmatprep.mubr.bf16.mxu0 %v409_v32 }
  0xb4   : > { %1167 = vmatmul.mubr.bf16.gmra.mxu0 %v410_v37 }
  0xb5   : > { %1170 = vmatprep.mubr.bf16.mxu0 %v411_v38 }
  0xbc   : > { %1171 = vmatmul.mubr.bf16.gmra.mxu0 %v412_v43 }
  0xbd   : > { %1174 = vmatprep.mubr.bf16.mxu0 %v413_v44 }
  0xc4   : > { %1175 = vmatmul.mubr.bf16.gmra.mxu0 %v414_v47 }
  0xc5   : > { %1242 = vmatprep.mubr.msk.f32.mxu0 %vm1567_vm0, %v1566_v16 }
 0x16c   : > { %v1164_v49 = vpop.f32.mrf.mxu0 }
 0x16e   : > { %v513_v50 = vpop.f32.mrf.mxu0 }
 0x170   : > { %v1165_v51 = vpop.f32.mrf.mxu0 }
 0x171   : > { %v593_v7 = vpack.c.bf16 %v1165_v51, %v1164_v49 }
 0x172   : > { %v516_v52 = vpop.f32.mrf.mxu0 }
 0x173   : > { %v592_v8 = vpack.c.bf16 %v516_v52, %v513_v50 }
 0x174   : > { %v1168_v53 = vpop.f32.mrf.mxu0 }
 0x176   : > { %v529_v54 = vpop.f32.mrf.mxu0 }
 0x178   : > { %v1169_v55 = vpop.f32.mrf.mxu0 }
 0x179   : > { %v595_v5 = vpack.c.bf16 %v1169_v55, %v1168_v53 }
 0x17a   : > { %v532_v56 = vpop.f32.mrf.mxu0 }
 0x17b   : > { %v594_v6 = vpack.c.bf16 %v532_v56, %v529_v54 }
 0x17c   : > { %v1172_v57 = vpop.f32.mrf.mxu0 }
 0x17e   : > { %v545_v58 = vpop.f32.mrf.mxu0 }
 0x180   : > { %v1173_v59 = vpop.f32.mrf.mxu0 }
 0x181   : > { %v597_v3 = vpack.c.bf16 %v1173_v59, %v1172_v57 }
 0x182   : > { %v548_v60 = vpop.f32.mrf.mxu0 }
 0x183   : > { %v596_v4 = vpack.c.bf16 %v548_v60, %v545_v58 }
 0x184   : > { %v1176_v61 = vpop.f32.mrf.mxu0 }
 0x186   : > { %v561_v62 = vpop.f32.mrf.mxu0 }
 0x188   : > { %v1177_v63 = vpop.f32.mrf.mxu0 }
 0x189   : > { %v599_v0 = vpack.c.bf16 %v1177_v63, %v1176_v61 }
 0x18a   : > { %v564_v1 = vpop.f32.mrf.mxu0 }
 0x18b   : > { %v598_v2 = vpack.c.bf16 %v564_v1, %v561_v62  ;;  %1178 = vmatprep.subr.bf16.mxu1 %v599_v0 }
 0x18c   : > { %1179 = vmatpush3.bf16.msra.mxu1 %v599_v0 }
 0x18d   : > { %1180 = vmatprep.subr.bf16.mxu1 %v598_v2 }
 0x190   : > { %1181 = vmatpush3.bf16.msra.mxu1 %v598_v2 }
 0x191   : > { %1182 = vmatprep.subr.bf16.mxu1 %v597_v3 }
 0x194   : > { %1183 = vmatpush3.bf16.msra.mxu1 %v597_v3 }
 0x195   : > { %1184 = vmatprep.subr.bf16.mxu1 %v596_v4 }
 0x198   : > { %1185 = vmatpush3.bf16.msra.mxu1 %v596_v4 }
 0x199   : > { %1186 = vmatprep.subr.bf16.mxu1 %v595_v5 }
 0x19c   : > { %1187 = vmatpush3.bf16.msra.mxu1 %v595_v5 }
 0x19d   : > { %1188 = vmatprep.subr.bf16.mxu1 %v594_v6 }
 0x1a0   : > { %1189 = vmatpush3.bf16.msra.mxu1 %v594_v6 }
 0x1a1   : > { %1190 = vmatprep.subr.bf16.mxu1 %v593_v7 }
 0x1a4   : > { %1191 = vmatpush3.bf16.msra.mxu1 %v593_v7 }
 0x1a5   : > { %1192 = vmatprep.subr.bf16.mxu1 %v592_v8 }
 0x1a8   : > { %1193 = vmatpush3.bf16.msra.mxu1 %v592_v8 }
 0x1ab   : > { %1195 = vmatmul.mubr.bf16.vlgmr.msra.gmra.mxu1 %v1341_v9 }
 0x1ac   : > { %1198 = vmatprep.mubr.bf16.mxu1 %v1342_v10 }
 0x1b3   : > { %1199 = vmatmul.mubr.bf16.gmra.mxu1 %v1343_v11 }
 0x1b4   : > { %1202 = vmatprep.mubr.bf16.mxu1 %v1344_v12 }
 0x1bb   : > { %1203 = vmatmul.mubr.bf16.gmra.mxu1 %v1345_v13 }
 0x1bc   : > { %1206 = vmatprep.mubr.bf16.mxu1 %v1346_v14 }
 0x1c3   : > { %1207 = vmatmul.mubr.bf16.gmra.mxu1 %v1347_v15 }
 0x26b   : > { %v1196_v18 = vpop.f32.mrf.mxu1 }
 0x26c   : > { %v698_v20 = vadd.f32 %v1196_v18, %v1820_v17 }
 0x26d   : > { %v689_v21 = vpop.f32.mrf.mxu1 }
 0x26e   : > { %vm754_vm1 = vcmp.gt.f32.partialorder %v698_v20, 0.0  ;;  %v777_v22 = vmul.f32 %v1825_v19, %v698_v20  ;;  %v690_v23 = vadd.f32 %v1820_v17, %v689_v21 }
 0x26f   : > { %v1197_v24 = vpop.f32.mrf.mxu1 }
 0x270   : > { %vm752_vm2 = vcmp.gt.f32.partialorder %v690_v23, 0.0  ;;  %v775_v25 = vmul.f32 %v1825_v19, %v690_v23  ;;  %v701_v26 = vadd.f32 %v1197_v24, %v1820_v17  ;;  %v1832_v27 = vsel %vm754_vm1, %v698_v20, %v777_v22 }
 0x271   : > { %v692_v28 = vpop.f32.mrf.mxu1  ;;  %809 = vst [vmem:[#allocation2 + $0x58] sm:$0xff] %v1832_v27  ;;  %825 = vst [vmem:[#allocation10 + $0x10] sm:$0xff] %v1832_v27 }
 0x272   : > { %vm755_vm3 = vcmp.gt.f32.partialorder %v701_v26, 0.0  ;;  %v778_v29 = vmul.f32 %v1825_v19, %v701_v26  ;;  %v693_v30 = vadd.f32 %v1820_v17, %v692_v28  ;;  %v1838_v31 = vsel %vm752_vm2, %v690_v23, %v775_v25 }
 0x273   : > { %v1200_v32 = vpop.f32.mrf.mxu1  ;;  %807 = vst [vmem:[#allocation2 + $0x30] sm:$0xff] %v1838_v31  ;;  %823 = vst [vmem:[#allocation10] sm:$0xff] %v1838_v31 }
 0x274   : > { %vm753_vm4 = vcmp.gt.f32.partialorder %v693_v30, 0.0  ;;  %v776_v33 = vmul.f32 %v1825_v19, %v693_v30  ;;  %v714_v34 = vadd.f32 %v1200_v32, %v1820_v17  ;;  %v1844_v35 = vsel %vm755_vm3, %v701_v26, %v778_v29 }
 0x275   : > { %v705_v36 = vpop.f32.mrf.mxu1  ;;  %810 = vst [vmem:[#allocation2 + $0x18] sm:$0xff] %v1844_v35  ;;  %826 = vst [vmem:[#allocation10 + $0x18] sm:$0xff] %v1844_v35 }
 0x276   : > { %vm758_vm5 = vcmp.gt.f32.partialorder %v714_v34, 0.0  ;;  %v781_v37 = vmul.f32 %v1825_v19, %v714_v34  ;;  %v706_v38 = vadd.f32 %v1820_v17, %v705_v36  ;;  %v1850_v39 = vsel %vm753_vm4, %v693_v30, %v776_v33 }
 0x277   : > { %v1201_v40 = vpop.f32.mrf.mxu1  ;;  %808 = vst [vmem:[#allocation2] sm:$0xff] %v1850_v39  ;;  %824 = vst [vmem:[#allocation10 + $0x8] sm:$0xff] %v1850_v39 }
 0x278   : > { %vm756_vm6 = vcmp.gt.f32.partialorder %v706_v38, 0.0  ;;  %v779_v41 = vmul.f32 %v1825_v19, %v706_v38  ;;  %v717_v42 = vadd.f32 %v1201_v40, %v1820_v17  ;;  %v1856_v43 = vsel %vm758_vm5, %v714_v34, %v781_v37 }
 0x279   : > { %v708_v44 = vpop.f32.mrf.mxu1  ;;  %813 = vst [vmem:[#allocation2 + $0x8] sm:$0xff] %v1856_v43  ;;  %829 = vst [vmem:[#allocation10 + $0x30] sm:$0xff] %v1856_v43 }
 0x27a   : > { %vm759_vm7 = vcmp.gt.f32.partialorder %v717_v42, 0.0  ;;  %v782_v45 = vmul.f32 %v1825_v19, %v717_v42  ;;  %v709_v46 = vadd.f32 %v1820_v17, %v708_v44  ;;  %v1862_v47 = vsel %vm756_vm6, %v706_v38, %v779_v41 }
 0x27b   : > { %v1204_v48 = vpop.f32.mrf.mxu1  ;;  %811 = vst [vmem:[#allocation2 + $0x50] sm:$0xff] %v1862_v47  ;;  %827 = vst [vmem:[#allocation10 + $0x20] sm:$0xff] %v1862_v47 }
 0x27c   : > { %vm757_vm8 = vcmp.gt.f32.partialorder %v709_v46, 0.0  ;;  %v780_v49 = vmul.f32 %v1825_v19, %v709_v46  ;;  %v730_v50 = vadd.f32 %v1204_v48, %v1820_v17  ;;  %v1868_v51 = vsel %vm759_vm7, %v717_v42, %v782_v45 }
 0x27d   : > { %v721_v52 = vpop.f32.mrf.mxu1  ;;  %814 = vst [vmem:[#allocation2 + $0x48] sm:$0xff] %v1868_v51  ;;  %830 = vst [vmem:[#allocation10 + $0x38] sm:$0xff] %v1868_v51 }
 0x27e   : > { %vm762_vm9 = vcmp.gt.f32.partialorder %v730_v50, 0.0  ;;  %v785_v53 = vmul.f32 %v1825_v19, %v730_v50  ;;  %v722_v54 = vadd.f32 %v1820_v17, %v721_v52  ;;  %v1874_v55 = vsel %vm757_vm8, %v709_v46, %v780_v49 }
 0x27f   : > { %v1205_v56 = vpop.f32.mrf.mxu1  ;;  %812 = vst [vmem:[#allocation2 + $0x68] sm:$0xff] %v1874_v55  ;;  %828 = vst [vmem:[#allocation10 + $0x28] sm:$0xff] %v1874_v55 }
 0x280   : > { %vm760_vm10 = vcmp.gt.f32.partialorder %v722_v54, 0.0  ;;  %v783_v57 = vmul.f32 %v1825_v19, %v722_v54  ;;  %v733_v58 = vadd.f32 %v1205_v56, %v1820_v17  ;;  %v801_v59 = vsel %vm762_vm9, %v730_v50, %v785_v53 }
 0x281   : > { %v724_v60 = vpop.f32.mrf.mxu1  ;;  %817 = vst [vmem:[#allocation2 + $0x10] sm:$0xff] %v801_v59  ;;  %833 = vst [vmem:[#allocation10 + $0x50] sm:$0xff] %v801_v59 }
 0x282   : > { %vm763_vm11 = vcmp.gt.f32.partialorder %v733_v58, 0.0  ;;  %v786_v61 = vmul.f32 %v1825_v19, %v733_v58  ;;  %v725_v62 = vadd.f32 %v1820_v17, %v724_v60  ;;  %v799_v63 = vsel %vm760_vm10, %v722_v54, %v783_v57 }
 0x283   : > { %v1208_v0 = vpop.f32.mrf.mxu1  ;;  %815 = vst [vmem:[#allocation2 + $0x40] sm:$0xff] %v799_v63  ;;  %831 = vst [vmem:[#allocation10 + $0x40] sm:$0xff] %v799_v63 }
 0x284   : > { %vm761_vm12 = vcmp.gt.f32.partialorder %v725_v62, 0.0  ;;  %v784_v1 = vmul.f32 %v1825_v19, %v725_v62  ;;  %v746_v2 = vadd.f32 %v1208_v0, %v1820_v17  ;;  %v802_v3 = vsel %vm763_vm11, %v733_v58, %v786_v61 }
 0x285   : > { %v737_v4 = vpop.f32.mrf.mxu1  ;;  %818 = vst [vmem:[#allocation2 + $0x38] sm:$0xff] %v802_v3  ;;  %834 = vst [vmem:[#allocation10 + $0x58] sm:$0xff] %v802_v3 }
 0x286   : > { %vm766_vm13 = vcmp.gt.f32.partialorder %v746_v2, 0.0  ;;  %v789_v5 = vmul.f32 %v1825_v19, %v746_v2  ;;  %v738_v6 = vadd.f32 %v1820_v17, %v737_v4  ;;  %v800_v7 = vsel %vm761_vm12, %v725_v62, %v784_v1 }
 0x287   : > { %v1209_v8 = vpop.f32.mrf.mxu1  ;;  %816 = vst [vmem:[#allocation2 + $0x20] sm:$0xff] %v800_v7  ;;  %832 = vst [vmem:[#allocation10 + $0x48] sm:$0xff] %v800_v7 }
 0x288   : > { %vm764_vm14 = vcmp.gt.f32.partialorder %v738_v6, 0.0  ;;  %v787_v9 = vmul.f32 %v1825_v19, %v738_v6  ;;  %v749_v10 = vadd.f32 %v1209_v8, %v1820_v17  ;;  %v805_v11 = vsel %vm766_vm13, %v746_v2, %v789_v5 }
 0x289   : > { %v740_v12 = vpop.f32.mrf.mxu1  ;;  %821 = vst [vmem:[#allocation2 + $0x78] sm:$0xff] %v805_v11  ;;  %837 = vst [vmem:[#allocation10 + $0x70] sm:$0xff] %v805_v11 }
 0x28a   : > { %vm767_vm15 = vcmp.gt.f32.partialorder %v749_v10, 0.0  ;;  %v790_v13 = vmul.f32 %v1825_v19, %v749_v10  ;;  %v741_v14 = vadd.f32 %v1820_v17, %v740_v12  ;;  %v803_v15 = vsel %vm764_vm14, %v738_v6, %v787_v9  ;;  %v839_v17 = vld [vmem:[%s1982_s5] sm:$0xff] }
 0x28b   : > { %819 = vst [vmem:[#allocation2 + $0x60] sm:$0xff] %v803_v15  ;;  %835 = vst [vmem:[#allocation10 + $0x60] sm:$0xff] %v803_v15 }
 0x28c   : > { %vm765_vm0 = vcmp.gt.f32.partialorder %v741_v14, 0.0  ;;  %v788_v18 = vmul.f32 %v1825_v19, %v741_v14  ;;  %v806_v20 = vsel %vm767_vm15, %v749_v10, %v790_v13 }
 0x28d   : > { %822 = vst [vmem:[#allocation2 + $0x28] sm:$0xff] %v806_v20  ;;  %838 = vst [vmem:[#allocation10 + $0x78] sm:$0xff] %v806_v20  ;;  %1211 = vmatpush3.msra.mxu0 %v806_v20 }
 0x28e   : > { %1212 = vmatprep.subr.mxu0 %v1566_v16  ;;  %v804_v21 = vsel %vm765_vm0, %v741_v14, %v788_v18 }
 0x28f   : > { %1213 = vmatpush3.msra.mxu0 %v805_v11  ;;  %820 = vst [vmem:[#allocation2 + $0x70] sm:$0xff] %v804_v21  ;;  %836 = vst [vmem:[#allocation10 + $0x68] sm:$0xff] %v804_v21 }
 0x290   : > { %1214 = vmatprep.subr.mxu0 %v1566_v16 }
 0x291   : > { %1215 = vmatpush3.msra.mxu0 %v804_v21 }
 0x292   : > { %1216 = vmatprep.subr.mxu0 %v1566_v16 }
 0x293   : > { %1217 = vmatpush3.msra.mxu0 %v803_v15 }
 0x294   : > { %1218 = vmatprep.subr.mxu0 %v1566_v16 }
 0x295   : > { %1219 = vmatpush3.msra.mxu0 %v802_v3 }
 0x296   : > { %1220 = vmatprep.subr.mxu0 %v1566_v16 }
 0x297   : > { %1221 = vmatpush3.msra.mxu0 %v801_v59 }
 0x298   : > { %1222 = vmatprep.subr.mxu0 %v1566_v16 }
 0x299   : > { %1223 = vmatpush3.msra.mxu0 %v800_v7 }
 0x29a   : > { %1224 = vmatprep.subr.mxu0 %v1566_v16 }
 0x29b   : > { %1225 = vmatpush3.msra.mxu0 %v799_v63 }
 0x29c   : > { %1226 = vmatprep.subr.mxu0 %v1566_v16 }
 0x29d   : > { %1227 = vmatpush3.msra.mxu0 %v1868_v51 }
 0x29e   : > { %1228 = vmatprep.subr.mxu0 %v1566_v16 }
 0x29f   : > { %1229 = vmatpush3.msra.mxu0 %v1856_v43 }
 0x2a0   : > { %1230 = vmatprep.subr.mxu0 %v1566_v16 }
 0x2a1   : > { %1231 = vmatpush3.msra.mxu0 %v1874_v55 }
 0x2a2   : > { %1232 = vmatprep.subr.mxu0 %v1566_v16 }
 0x2a3   : > { %1233 = vmatpush3.msra.mxu0 %v1862_v47 }
 0x2a4   : > { %1234 = vmatprep.subr.mxu0 %v1566_v16 }
 0x2a5   : > { %1235 = vmatpush3.msra.mxu0 %v1844_v35 }
 0x2a6   : > { %1236 = vmatprep.subr.mxu0 %v1566_v16 }
 0x2a7   : > { %1237 = vmatpush3.msra.mxu0 %v1832_v27 }
 0x2a8   : > { %1238 = vmatprep.subr.mxu0 %v1566_v16 }
 0x2a9   : > { %1239 = vmatpush3.msra.mxu0 %v1850_v39 }
 0x2aa   : > { %1240 = vmatprep.subr.mxu0 %v1566_v16 }
 0x2ab   : > { %1241 = vmatpush3.msra.mxu0 %v1838_v31 }
 0x2ac   : > { %1243 = vmatmul.mubr.f32.vlgmr.msra.gmra.mxu0 %v839_v17 }
 0x2ad   : > { %1469 = shalt.err (!%p1466_p1)
}
 0x2ae   : > { %s1569_s14 = smov 128   ;;  %s1570_s17 = smov 8  }
 0x2af   : > { %p2021_p0 = pmov %p2020_p9  ;;  %s1092_s0 = sshll.u32 %s1633_s28, 7 }
 0x2b0   : > { %s938_s15 = sshll.u32 %s1804_s21, 4  ;;  %s1929_s11 = scalar_lea.hbm %s1984_s7, %s1092_s0  ;;  %s1931_s15 = int_to_ptr.vmem [resolvable:$true] %s938_s15 }
 0x2b1   : > { %1258 = dma.vmem_to_hbm [thread:$0]  (%p2021_p0), %s923_s29, 2048, %s1983_s6, [#allocation5], %s1569_s14, %s1569_s14, %s1570_s17  }
 0x2b2   : > { %s912_s30 = scalar_lea.sflag [#allocation12], %s1793_s8  ;;  %s1480_s12 = scalar_lea.vmem %s1931_s15, 128 }
 0x2b3   : > { %p1481_p7 = scmp.ne.s32.totalorder %s1931_s15, %s1480_s12  ;;  %p2022_p3 = scmp.ne.s32.totalorder %s2002_s13, 0 }
 0x2b4   : > { %s1571_s9 = smov [#allocation11]  }
 0x2b5   : > { %p1482_p12 = pnand %p1481_p7, %p2022_p3  ;;  %s1484_s10 = sshll.u32 %s1571_s9, 4  ;;  %s1485_s10 = int_to_ptr.vmem [resolvable:$false] %s1484_s10 }
 0x2b6   : > { %s1486_s18 = scalar_lea.vmem %s1485_s10, 256  ;;  %p1487_p4 = scmp.lt.s32.totalorder %s1931_s15, %s1485_s10 }
 0x2b7   : > { %p1483_p6 = pneg %p1482_p12  ;;  %p1488_p13 = scmp.lt.s32.totalorder %s1486_s18, %s1480_s12 }
 0x2b9   : > { %p1489_p9 = por %p1488_p13, %p1487_p4 }
 0x2bb   : > { %p1490_p8 = pnand %p1489_p9, %p1483_p6 }
 0x36c   : > { %v906_v16 = vpop.f32.mrf.mxu0 }
 0x36d   : > { %910 = vst [vmem:[%s1804_s21] sm:$0xff] %v906_v16 }
 0x36e   : > { %v1244_v19 = vpop.f32.mrf.mxu0 }
 0x36f   : > { %1493 = shalt.err (!%p1490_p8)
}
 0x370   : > { %s1494_s21 = scalar_lea.hbm %s1929_s11, 128  ;;  %s1498_s29 = scalar_lea.hbm %s1984_s7, 256 }
 0x371   : > { %p1495_p10 = scmp.ne.s32.totalorder %s1929_s11, %s1494_s21  ;;  %p1499_p11 = scmp.lt.s32.totalorder %s1929_s11, %s1984_s7 }
 0x372   : > { %p1500_p1 = scmp.lt.s32.totalorder %s1498_s29, %s1494_s21 }
 0x373   : > { %p1496_p2 = pnand %p1495_p10, %p2022_p3 }
 0x374   : > { %p1501_p0 = por %p1500_p1, %p1499_p11 }
 0x375   : > { %p1497_p5 = pneg %p1496_p2 }
 0x377   : > { %p1502_p7 = pnand %p1501_p0, %p1497_p5 }
 0x379   : > { %1505 = shalt.err (!%p1502_p7)
}
 0x37a   : > { %1259 = dma.vmem_to_hbm [thread:$0]  (%p2022_p3), %s1931_s15, 128, %s1929_s11, %s912_s30  }
 0x37b   : > { %p2023_p12 = scmp.eq.s32.totalorder %s1633_s28, 1 }
 0x37d   : > { %1535 = dma.done.wait (%p2023_p12), [#allocation5], 2048   ;;  %p2024_p6 = pmov %p2023_p12 }
 0x37f   : > { %1537 = vsyncadd (%p2024_p6), [#allocation5], 4294965248 }
 0x380 PF: > { %s2025_s17 = sld [smem:[#allocation20_spill]]  ;;  %s954_s19 = sand.u32 1, %s1544_s24  }
 0x381   : > { %p2027_p13 = scmp.ge.s32.totalorder %s1556_s27, 2  ;;  %s955_s2 = scalar_lea.sflag [#allocation12], %s954_s19 }
 0x386   : > { %p2026_p4 = scmp.ne.s32.totalorder %s2025_s17, 0 }
 0x388   : > { %p1278_p9 = pnand %p2027_p13, %p2026_p4 }
 0x38a   : > { %p1279_p8 = pneg %p1278_p9 }
 0x38c   : > { %1539 = dma.done.wait (%p1279_p8), %s955_s2, 128  }
 0x38d   : > { %1541 = vsyncadd (%p1279_p8), %s955_s2, 4294967168  ;;  %s2028_s27 = sld [smem:[#allocation18_spill]]  ;;  %s2030_s24 = smov %s1548_s25 }
 0x38e   : > { %s2029_s13 = sld [smem:[#allocation19_spill]]  ;;  %s2031_s25 = smov %s1552_s26 }
 0x393   : > { %p21_p3 = scmp.ge.s32.totalorder %s2028_s27, 4  }
 0x394   : > { %s2032_s26 = smov %s2029_s13 }
 0x395   :  { %23 = sbr.rel (!%p21_p3) target bundleno = 9 (0x9), region = 120 }
 0x39a   :  { %960 = vsyncpa [#allocation4], 1 }
 0x39b   :  { %962 = vsyncpa [#allocation4 + $0x1], 1 }
 0x39c   :  { %963 = vsyncpa [#allocation7], 1 }
 0x39d   :  { %964 = vsyncpa [#allocation5], 1 }
 0x39e   :  { %966 = vsyncpa [#allocation5 + $0x1], 1 }
 0x39f   :  { %967 = vsyncpa [#allocation12], 1 }
 0x3a0   :  { %969 = vsyncpa [#allocation12 + $0x1], 1 }

</bundles_post_ra>
